<compile_context>
chip_gen: v7x
topology: tpu7x:2x2x1
jax: 0.10.0
libtpu: 0.0.40
codegen_flags: <defaults>
</compile_context>

<pallas_src>
import math
from functools import partial

import jax
import jax.numpy as jnp
from jax import lax
from jax.experimental import pallas as pl
from jax.experimental.pallas import tpu as pltpu


_VMEM_LIMIT = 48 * 1024 * 1024  # < v7x physical 64 MiB, > v5e/v6e scoped defaults


def _pick_tile(dim, target):
    """Largest tile <= target that evenly divides dim (full dim if small)."""
    if dim <= target:
        return dim
    t = target
    while dim % t != 0 and t > 1:
        t //= 2
    return max(t, 1)


# ----------------------------------------------------------------------------
# Tiled matmul  (x @ w.T  with nn.Linear weight layout (N, K)), f32 accumulation
# ----------------------------------------------------------------------------
def _matmul_kernel(x_ref, w_ref, o_ref, acc_ref):
    @pl.when(pl.program_id(2) == 0)
    def _init():
        acc_ref[...] = jnp.zeros_like(acc_ref)

    # Contract K of both operands directly -> no in-kernel transpose.
    acc_ref[...] += lax.dot_general(
        x_ref[...], w_ref[...],
        dimension_numbers=(((1,), (1,)), ((), ())),
        preferred_element_type=jnp.float32,
    )

    @pl.when(pl.program_id(2) == pl.num_programs(2) - 1)
    def _flush():
        o_ref[...] = acc_ref[...].astype(o_ref.dtype)


def matmul_nt(x, w, *, tm=256, tn=256, tk=512):
    """x: (M, K), w: (N, K) -> (M, N) = x @ w.T, tiled + pipelined on the MXU."""
    M, K = x.shape
    N, Kw = w.shape
    assert K == Kw
    tm = _pick_tile(M, tm)
    tn = _pick_tile(N, tn)
    tk = _pick_tile(K, tk)
    grid = (M // tm, N // tn, K // tk)

    bytes_accessed = (x.size * x.dtype.itemsize
                      + w.size * w.dtype.itemsize
                      + M * N * x.dtype.itemsize)

    return pl.pallas_call(
        _matmul_kernel,
        out_shape=jax.ShapeDtypeStruct((M, N), x.dtype),
        grid=grid,
        in_specs=[
            pl.BlockSpec((tm, tk), lambda i, j, k: (i, k)),
            pl.BlockSpec((tn, tk), lambda i, j, k: (j, k)),
        ],
        out_specs=pl.BlockSpec((tm, tn), lambda i, j, k: (i, j)),
        scratch_shapes=[pltpu.VMEM((tm, tn), jnp.float32)],
        compiler_params=pltpu.CompilerParams(
            dimension_semantics=("parallel", "parallel", "arbitrary"),
            vmem_limit_bytes=_VMEM_LIMIT,
        ),
        cost_estimate=pl.CostEstimate(
            flops=2 * M * N * K, transcendentals=0, bytes_accessed=bytes_accessed
        ),
    )(x, w)


# ----------------------------------------------------------------------------
# Flash-attention (online softmax), tiled over the KV axis, GQA via index_map
# ----------------------------------------------------------------------------
def _flash_attn_kernel(q_ref, k_ref, v_ref, bias_ref, o_ref,
                       m_scr, l_scr, acc_scr, *, scale):
    kvi = pl.program_id(3)

    @pl.when(kvi == 0)
    def _init():
        m_scr[...] = jnp.full_like(m_scr, -jnp.inf)
        l_scr[...] = jnp.zeros_like(l_scr)
        acc_scr[...] = jnp.zeros_like(acc_scr)

    q = q_ref[0, 0]                       # (tq, D)
    k = k_ref[0, 0]                       # (tkv, D)
    v = v_ref[0, 0]                       # (tkv, D)
    bias = bias_ref[0, 0].astype(jnp.float32)   # (tq, tkv) additive mask tile

    # s = q @ k^T without transposing k (contract D of both), f32 accumulate.
    s = lax.dot_general(q, k, (((1,), (1,)), ((), ())),
                        preferred_element_type=jnp.float32)
    s = s * scale + bias

    m_prev = m_scr[...]
    m_new = jnp.maximum(m_prev, jnp.max(s, axis=-1, keepdims=True))
    alpha = jnp.exp(m_prev - m_new)
    p = jnp.exp(s - m_new)                # f32 softmax numerator

    l_scr[...] = alpha * l_scr[...] + jnp.sum(p, axis=-1, keepdims=True)
    # Cast probabilities to activation dtype before PV (matches torch .to(q.dtype)).
    acc_scr[...] = alpha * acc_scr[...] + lax.dot_general(
        p.astype(v.dtype), v, (((1,), (0,)), ((), ())),
        preferred_element_type=jnp.float32,
    )
    m_scr[...] = m_new

    @pl.when(kvi == pl.num_programs(3) - 1)
    def _finalize():
        inv_l = pl.reciprocal(l_scr[...], approx=True)
        o_ref[0, 0] = (acc_scr[...] * inv_l).astype(o_ref.dtype)


def flash_attention(q, k, v, mask, num_key_value_groups, *, tq=256, tkv=512):
    """
    q:    (B, nH,   S, D)
    k, v: (B, nHkv, S, D)   (GQA: query head h reads kv head h // groups)
    mask: (B, 1, S, S) additive mask (finite negatives for masked positions)
    returns (B, nH, S, D)
    """
    B, nH, S, D = q.shape
    g = num_key_value_groups
    scale = 1.0 / math.sqrt(D)
    tq = _pick_tile(S, tq)
    tkv = _pick_tile(S, tkv)
    grid = (B, nH, S // tq, S // tkv)

    bytes_accessed = ((q.size + k.size + v.size + q.size) * q.dtype.itemsize
                      + mask.size * mask.dtype.itemsize)

    kernel = partial(_flash_attn_kernel, scale=scale)
    return pl.pallas_call(
        kernel,
        out_shape=jax.ShapeDtypeStruct((B, nH, S, D), q.dtype),
        grid=grid,
        in_specs=[
            pl.BlockSpec((1, 1, tq, D), lambda b, h, qi, ki: (b, h, qi, 0)),
            pl.BlockSpec((1, 1, tkv, D), lambda b, h, qi, ki: (b, h // g, ki, 0)),
            pl.BlockSpec((1, 1, tkv, D), lambda b, h, qi, ki: (b, h // g, ki, 0)),
            pl.BlockSpec((1, 1, tq, tkv), lambda b, h, qi, ki: (b, 0, qi, ki)),
        ],
        out_specs=pl.BlockSpec((1, 1, tq, D), lambda b, h, qi, ki: (b, h, qi, 0)),
        scratch_shapes=[
            pltpu.VMEM((tq, 1), jnp.float32),   # running max
            pltpu.VMEM((tq, 1), jnp.float32),   # running denominator
            pltpu.VMEM((tq, D), jnp.float32),   # output accumulator
        ],
        compiler_params=pltpu.CompilerParams(
            dimension_semantics=("parallel", "parallel", "parallel", "arbitrary"),
            vmem_limit_bytes=_VMEM_LIMIT,
        ),
        cost_estimate=pl.CostEstimate(
            flops=4 * B * nH * S * S * D,
            transcendentals=B * nH * S * S,
            bytes_accessed=bytes_accessed,
        ),
    )(q, k, v, mask)


# ----------------------------------------------------------------------------
# Glue (RoPE, reshapes) in plain JAX
# ----------------------------------------------------------------------------
# TODO(synk): fuse RoPE into the attention kernel prologue (interleaved halves
# need a lane permute; kept in XLA glue for lowering robustness at small D).
def apply_rotary_pos_emb(q, k, cos, sin, position_ids):
    # q, k: (B, nH, S, D); cos, sin: (max_pos, >= D//2); position_ids: (B, S)
    cos = cos[position_ids][:, None, :, :]   # (B, 1, S, *)
    sin = sin[position_ids][:, None, :, :]
    q1, q2 = q[..., 0::2], q[..., 1::2]
    k1, k2 = k[..., 0::2], k[..., 1::2]
    cos = cos[..., : q1.shape[-1]]
    sin = sin[..., : q1.shape[-1]]
    q_rot = jnp.concatenate([q1 * cos - q2 * sin, q2 * cos + q1 * sin], axis=-1)
    k_rot = jnp.concatenate([k1 * cos - k2 * sin, k2 * cos + k1 * sin], axis=-1)
    return q_rot, k_rot


class PatchedLlama3AttentionPallas:
    def __init__(self, hidden_size, num_heads, num_key_value_heads, key,
                 param_dtype=jnp.bfloat16):
        self.hidden_size = hidden_size
        self.num_heads = num_heads
        self.head_dim = hidden_size // num_heads
        self.num_key_value_heads = num_key_value_heads
        self.num_key_value_groups = num_heads // num_key_value_heads
        self.param_dtype = param_dtype

        k1, k2, k3, k4 = jax.random.split(key, 4)
        init = lambda k, shape: (
            0.02 * jax.random.normal(k, shape, dtype=jnp.float32)
        ).astype(param_dtype)
        # nn.Linear(in, out, bias=False) weight shape = (out, in)
        self.wq = init(k1, (num_heads * self.head_dim, hidden_size))
        self.wk = init(k2, (num_key_value_heads * self.head_dim, hidden_size))
        self.wv = init(k3, (num_key_value_heads * self.head_dim, hidden_size))
        self.wo = init(k4, (hidden_size, hidden_size))
        # Fused QKV weight: x is read from HBM once for all three projections.
        self.w_qkv = jnp.concatenate([self.wq, self.wk, self.wv], axis=0)

    def __call__(self, hidden_states, attention_mask, position_ids=None,
                 freqs_cis=None):
        B, S, H = hidden_states.shape
        nH, nKV, D = self.num_heads, self.num_key_value_heads, self.head_dim
        cdtype = self.param_dtype

        x2d = hidden_states.reshape(B * S, H).astype(cdtype)
        qkv = matmul_nt(x2d, self.w_qkv)                      # (B*S, (nH+2nKV)*D)
        qd, kd = nH * D, nKV * D
        # TODO(synk): read Q/K/V head-major directly via BlockSpec index maps
        # instead of glue transposes (kept in XLA for (8,128)-layout safety).
        q = qkv[:, :qd].reshape(B, S, nH, D).transpose(0, 2, 1, 3)
        k = qkv[:, qd:qd + kd].reshape(B, S, nKV, D).transpose(0, 2, 1, 3)
        v = qkv[:, qd + kd:].reshape(B, S, nKV, D).transpose(0, 2, 1, 3)

        if freqs_cis is not None:
            cos, sin = freqs_cis
            if position_ids is None:
                position_ids = jnp.broadcast_to(jnp.arange(S)[None, :], (B, S))
            q, k = apply_rotary_pos_emb(q, k, cos, sin, position_ids)
            q = q.astype(cdtype)
            k = k.astype(cdtype)

        attn = flash_attention(q, k, v, attention_mask, self.num_key_value_groups)

        attn2d = attn.transpose(0, 2, 1, 3).reshape(B * S, nH * D)
        out = matmul_nt(attn2d, self.wo).reshape(B, S, H)
        # attn_weights never materialized by the flash kernel (output_attentions
        # unsupported); past_key_value unused, matching the reference defaults.
        return out, None, None


# ----------------------------------------------------------------------------
# Pure-JAX (f32) reference for a sanity check
# ----------------------------------------------------------------------------
def reference_forward(mod, hidden_states, attention_mask, freqs_cis):
    f32 = jnp.float32
    B, S, H = hidden_states.shape
    nH, nKV, D = mod.num_heads, mod.num_key_value_heads, mod.head_dim
    x = hidden_states.astype(f32)
    wq, wk = mod.wq.astype(f32), mod.wk.astype(f32)
    wv, wo = mod.wv.astype(f32), mod.wo.astype(f32)
    q = (x @ wq.T).reshape(B, S, nH, D).transpose(0, 2, 1, 3)
    k = (x @ wk.T).reshape(B, S, nKV, D).transpose(0, 2, 1, 3)
    v = (x @ wv.T).reshape(B, S, nKV, D).transpose(0, 2, 1, 3)
    cos, sin = freqs_cis
    pos = jnp.broadcast_to(jnp.arange(S)[None, :], (B, S))
    q, k = apply_rotary_pos_emb(q, k, cos, sin, pos)
    k = jnp.repeat(k, mod.num_key_value_groups, axis=1)
    v = jnp.repeat(v, mod.num_key_value_groups, axis=1)
    w = jnp.einsum("bhqd,bhkd->bhqk", q, k) / math.sqrt(D) + attention_mask
    w = jax.nn.softmax(w.astype(f32), axis=-1)
    o = jnp.einsum("bhqk,bhkd->bhqd", w, v)
    o = o.transpose(0, 2, 1, 3).reshape(B, S, nH * D)
    return o @ wo.T


# ----------------------------------------------------------------------------
if __name__ == "__main__":
    # Small shapes consistent with the module: B=2, S=8, hidden=32,
    # 4 query heads, 2 kv heads (GQA groups = 2), head_dim = 8.
    B, S, H = 2, 8, 32
    NUM_HEADS, NUM_KV_HEADS = 4, 2
    D = H // NUM_HEADS

    key = jax.random.PRNGKey(0)
    k_params, k_x = jax.random.split(key)

    mod = PatchedLlama3AttentionPallas(H, NUM_HEADS, NUM_KV_HEADS, k_params,
                                       param_dtype=jnp.bfloat16)

    hidden_states = jax.random.normal(k_x, (B, S, H), dtype=jnp.float32)

    # Causal additive attention mask (B, 1, S, S): 0 on/below diag, -1e9 above.
    causal = jnp.tril(jnp.ones((S, S), dtype=bool))
    attention_mask = jnp.where(causal, 0.0, -1e9).astype(jnp.float32)
    attention_mask = jnp.broadcast_to(attention_mask[None, None], (B, 1, S, S))

    # RoPE tables: cos/sin of shape (S, D//2) (llama-style inv_freq).
    inv_freq = 1.0 / (10000.0 ** (jnp.arange(0, D, 2, dtype=jnp.float32) / D))
    freqs = jnp.arange(S, dtype=jnp.float32)[:, None] * inv_freq[None, :]
    freqs_cis = (jnp.cos(freqs), jnp.sin(freqs))

    out, attn_w, past_kv = mod(hidden_states, attention_mask, freqs_cis=freqs_cis)
    out = jax.block_until_ready(out)

    ref = reference_forward(mod, hidden_states, attention_mask, freqs_cis)
    assert out.shape == (B, S, H)
    # bf16 MXU inputs + approx reciprocal -> compare against f32 reference with
    # a bf16-appropriate tolerance.
    assert jnp.allclose(out.astype(jnp.float32), ref, atol=2e-2, rtol=2e-2), \
        "mismatch vs. JAX reference"

    print("KERNEL_OK")
</pallas_src>

<mosaic_0001>
module attributes {stable_mosaic.version = 11 : i64} {
  func.func @_matmul_kernel(%arg0: i32, %arg1: i32, %arg2: i32, %arg3: memref<16x32xbf16, #tpu.memory_space<vmem>>, %arg4: memref<64x32xbf16, #tpu.memory_space<vmem>>, %arg5: memref<16x64xbf16, #tpu.memory_space<vmem>>, %arg6: memref<16x64xf32, #tpu.memory_space<vmem>>) attributes {dimension_semantics = [#tpu.dimension_semantics<parallel>, #tpu.dimension_semantics<parallel>, #tpu.dimension_semantics<arbitrary>], iteration_bounds = array<i64: 1, 1, 1>, scalar_prefetch = 0 : i64, scratch_operands = 1 : i64, tpu.core_type = #tpu.core_type<tc>, window_params = [{transform_indices = @transform_0, window_bounds = array<i64: 16, 32>}, {transform_indices = @transform_1, window_bounds = array<i64: 64, 32>}, {transform_indices = @transform_2, window_bounds = array<i64: 16, 64>}]} {
    %c0_i32 = arith.constant 0 : i32
    %0 = arith.cmpi eq, %arg2, %c0_i32 : i32
    %1 = arith.extui %0 : i1 to i32
    %c0_i32_0 = arith.constant 0 : i32
    %2 = arith.cmpi ne, %1, %c0_i32_0 : i32
    scf.if %2 {
      %cst_10 = arith.constant 0.000000e+00 : f32
      %12 = vector.broadcast %cst_10 : f32 to vector<16x64xf32>
      %c0_11 = arith.constant 0 : index
      %c0_12 = arith.constant 0 : index
      %13 = vector.load %arg6[%c0_11, %c0_12] : memref<16x64xf32, #tpu.memory_space<vmem>>, vector<16x64xf32>
      tpu.vector_store %arg6[%c0_11, %c0_12], %12 {strides = array<i32>} : memref<16x64xf32, #tpu.memory_space<vmem>>, vector<16x64xf32>,
    } else {
    }
    %c0 = arith.constant 0 : index
    %c0_1 = arith.constant 0 : index
    %3 = vector.load %arg6[%c0, %c0_1] : memref<16x64xf32, #tpu.memory_space<vmem>>, vector<16x64xf32>
    %c0_2 = arith.constant 0 : index
    %c0_3 = arith.constant 0 : index
    %4 = vector.load %arg3[%c0_2, %c0_3] : memref<16x32xbf16, #tpu.memory_space<vmem>>, vector<16x32xbf16>
    %c0_4 = arith.constant 0 : index
    %c0_5 = arith.constant 0 : index
    %5 = vector.load %arg4[%c0_4, %c0_5] : memref<64x32xbf16, #tpu.memory_space<vmem>>, vector<64x32xbf16>
    %cst = arith.constant dense<0.000000e+00> : vector<16x64xf32>
    %6 = tpu.matmul %4, %5, %cst {dimension_numbers = #tpu.dot_dimension_numbers<[1], [1], [0], [0], [0, 0, 1, 0], [], []>} : vector<16x32xbf16>, vector<64x32xbf16>, vector<16x64xf32> -> vector<16x64xf32>
    %7 = arith.addf %3, %6 : vector<16x64xf32>
    %c0_6 = arith.constant 0 : index
    %c0_7 = arith.constant 0 : index
    %8 = vector.load %arg6[%c0_6, %c0_7] : memref<16x64xf32, #tpu.memory_space<vmem>>, vector<16x64xf32>
    tpu.vector_store %arg6[%c0_6, %c0_7], %7 {strides = array<i32>} : memref<16x64xf32, #tpu.memory_space<vmem>>, vector<16x64xf32>,
    %c0_i32_8 = arith.constant 0 : i32
    %9 = arith.cmpi eq, %arg2, %c0_i32_8 : i32
    %10 = arith.extui %9 : i1 to i32
    %c0_i32_9 = arith.constant 0 : i32
    %11 = arith.cmpi ne, %10, %c0_i32_9 : i32
    scf.if %11 {
      %c0_10 = arith.constant 0 : index
      %c0_11 = arith.constant 0 : index
      %12 = vector.load %arg6[%c0_10, %c0_11] : memref<16x64xf32, #tpu.memory_space<vmem>>, vector<16x64xf32>
      %13 = arith.truncf %12 : vector<16x64xf32> to vector<16x64xbf16>
      %c0_12 = arith.constant 0 : index
      %c0_13 = arith.constant 0 : index
      %14 = vector.load %arg5[%c0_12, %c0_13] : memref<16x64xbf16, #tpu.memory_space<vmem>>, vector<16x64xbf16>
      tpu.vector_store %arg5[%c0_12, %c0_13], %13 {strides = array<i32>} : memref<16x64xbf16, #tpu.memory_space<vmem>>, vector<16x64xbf16>,
    } else {
    }
    return
  }
  func.func @transform_0(%arg0: i32, %arg1: i32, %arg2: i32) -> (i32, i32) {
    %c0_i32 = arith.constant 0 : i32
    return %arg0, %arg2 : i32, i32
  }
  func.func @transform_1(%arg0: i32, %arg1: i32, %arg2: i32) -> (i32, i32) {
    %c0_i32 = arith.constant 0 : i32
    return %arg1, %arg2 : i32, i32
  }
  func.func @transform_2(%arg0: i32, %arg1: i32, %arg2: i32) -> (i32, i32) {
    %c0_i32 = arith.constant 0 : i32
    return %arg0, %arg1 : i32, i32
  }
}

</mosaic_0001>

<bundles_post_ra>
// kernel: tpu_custom_call.1
= control target key start
LH: loop header
LB: loop body
LE: loop exit
PB: predicated region body
PF: predicated region fallthrough
CT: control target
= control target key end

     0   :  { %v212_v1 = vmov 0.0   ;;  %vm57_vm0 = vcmask 261120   ;;  %vm213_vm1 = vmmov 0   ;;  %vm17_vm2 = vcmask 523264   ;;  %s268_s0 = inlined_call_operand.vmem [shape: bf16[16,32], index: 0, kind: input, shape index: {}]   ;;  %s269_s1 = inlined_call_operand.vmem [shape: bf16[64,32], index: 1, kind: input, shape index: {}]   ;;  %s270_s2 = inlined_call_operand.hbm [shape: bf16[16,64], index: 2, kind: output, shape index: {}]  }
   0x1   :  { %v183_v0 = vld [vmem:[%s269_s1] sm:$0xff]   ;;  %166 = vmatprep.subr.bf16.mxu0 %v212_v1  ;;  %v184_v3 = vld [vmem:[%s269_s1 + $0x8] sm:$0xff]   ;;  %174 = vmatprep.mubr.msk.bf16.mxu0 %vm213_vm1, %v212_v1 }
   0x2   :  { %v62_v2 = vsel %vm57_vm0, %v183_v0, 0 }
   0x3   :  { %167 = vmatpush3.bf16.xpose.msra.mxu0 %v62_v2 }
   0x4   :  { %168 = vmatprep.subr.bf16.mxu0 %v212_v1 }
   0x5   :  { %7 = vsyncpa [#allocation4], 0  ;;  %18 = vst.msk [vmem:[#allocation2] sm:$0xff] %vm17_vm2, %v212_v1  ;;  %v65_v4 = vsel %vm57_vm0, %v184_v3, 0  ;;  %v185_v5 = vld [vmem:[%s269_s1 + $0x10] sm:$0xff]   ;;  %v186_v7 = vld [vmem:[%s269_s1 + $0x18] sm:$0xff]  }
   0x6   :  { %19 = vst.msk [vmem:[#allocation2 + $0x8] sm:$0xff] %vm17_vm2, %v212_v1  ;;  %v68_v6 = vsel %vm57_vm0, %v185_v5, 0  ;;  %v71_v8 = vsel %vm57_vm0, %v186_v7, 0  ;;  %v187_v9 = vld [vmem:[%s268_s0] sm:$0xff]   ;;  %s214_s1 = smov [#allocation3]   ;;  %vm132_vm3 = vcmask 519168  }
   0x7   :  { %s140_s19 = sshll.u32 %s214_s1, 4  ;;  %s141_s19 = int_to_ptr.vmem [resolvable:$true] %s140_s19 }
   0x8   :  { %s188_s0 = scalar_lea.vmem %s141_s19, 128  ;;  %p193_p1 = scmp.lt.s32.totalorder %s141_s19, %s141_s19 }
   0x9   :  { %p189_p0 = scmp.ne.s32.totalorder %s141_s19, %s188_s0  ;;  %p194_p2 = scmp.lt.s32.totalorder %s188_s0, %s188_s0 }
   0xb   :  { %169 = vmatpush3.bf16.xpose.msra.mxu0 %v65_v4  ;;  %p195_p3 = por %p194_p2, %p193_p1 }
   0xc   :  { %170 = vmatprep.subr.bf16.mxu0 %v212_v1  ;;  %v20_v10 = vld [vmem:[#allocation2] sm:$0xff] }
   0xd   :  { %v21_v12 = vld [vmem:[#allocation2 + $0x8] sm:$0xff]  ;;  %p196_p4 = pnand %p195_p3, %p189_p0 }
  0x13   :  { %171 = vmatpush3.bf16.xpose.msra.mxu0 %v68_v6 }
  0x14   :  { %172 = vmatprep.subr.bf16.mxu0 %v212_v1 }
  0x1b   :  { %173 = vmatpush3.bf16.xpose.msra.mxu0 %v71_v8 }
  0x22   :  { %175 = vmatmul.mubr.msk.bf16.vlgmr.msra.gmra.mrb[0].mxu0 %vm57_vm0, %v187_v9 }
  0xf5   :  { %v107_v11 = vpop.f32.mrb[0].mxu0 }
  0xf6   :  { %v114_v13 = vadd.f32 %v107_v11, %v20_v10  ;;  %v176_v14 = vpop.f32.mrb[1].mxu0 }
  0xf7   :  { %v110_v15 = vpop.f32.mrb[2].mxu0 }
  0xf8   :  { %117 = vst.msk [vmem:[#allocation2] sm:$0xff] %vm17_vm2, %v114_v13  ;;  %v115_v16 = vadd.f32 %v110_v15, %v21_v12  ;;  %v177_v17 = vpop.f32.mrb[3].mxu0 }
  0xfa   :  { %118 = vst.msk [vmem:[#allocation2 + $0x8] sm:$0xff] %vm17_vm2, %v115_v16 }
  0xff   :  { %v122_v18 = vld [vmem:[#allocation2] sm:$0xff] }
 0x100   :  { %v159_v19 = vpack.c.bf16 %v122_v18, %v122_v18 }
 0x101   :  { %v123_v20 = vld [vmem:[#allocation2 + $0x8] sm:$0xff] }
 0x102   :  { %v160_v21 = vpack.c.bf16 %v123_v20, %v123_v20  ;;  %133 = vst.msk [vmem:[#allocation3] sm:$0xf] %vm132_vm3, %v159_v19 }
 0x104   :  { %134 = vst.msk [vmem:[#allocation3 + $0x4] sm:$0xf] %vm132_vm3, %v160_v21 }
 0x105   :  { %199 = shalt.err (!%p196_p4)
}
 0x106   :  { %s200_s22 = scalar_lea.hbm %s270_s2, 128 }
 0x107   :  { %p201_p5 = scmp.ne.s32.totalorder %s270_s2, %s200_s22  ;;  %p204_p6 = scmp.lt.u32.totalorder %s200_s22, %s270_s2 }
 0x109   :  { %p206_p7 = pnand %p204_p6, %p201_p5 }
 0x10b   :  { %209 = shalt.err (!%p206_p7)
}
 0x10c   :  { %s215_s27 = smov 64   ;;  %s216_s28 = smov 4  }
 0x10d   :  { %146 = dma.vmem_to_hbm [thread:$0]  %s141_s19, 128, %s270_s2, [#allocation4], %s215_s27, %s215_s27, %s216_s28  }
 0x10e   :  { %210 = dma.done.wait [#allocation4], 128  }
 0x10f   :  { %211 = vsyncadd [#allocation4], 4294967168 }
 0x110   :  { %150 = vsyncpa [#allocation4], 1 }

</bundles_post_ra>
